<compile_context>
chip_gen: v7x
topology: tpu7x:2x2x1
jax: 0.10.0
libtpu: 0.0.40
codegen_flags: <defaults>
</compile_context>

<pallas_src>
import jax
import jax.numpy as jnp
from jax.experimental import pallas as pl
from jax.experimental.pallas import tpu as pltpu


def _choose_block_rows(total_rows, w, itemsize):
    """Rows of x2 per grid step: big DMAs, rows % 8 == 0, prefer >= 2 steps."""
    budget = 12 * 1024 * 1024                      # ~double-buffered in+out blocks
    max_rows = max(8, budget // (10 * w * itemsize))
    # ascending #blocks -> descending block size; first fit = largest valid block
    for nb in range(2, total_rows + 1):
        if total_rows % nb:
            continue
        br = total_rows // nb
        if br % 8:
            continue
        if br <= max_rows:
            return br
    if total_rows <= max_rows:
        return total_rows                          # single full-extent block (legal)
    return max(8, (max_rows // 8) * 8)             # ragged fallback; Pallas masks tail


def _choose_chunk_rows(block_rows):
    """Rows per in-kernel matmul chunk (keeps L small, amortizes MXU issue cost)."""
    for s in (256, 128, 64, 32, 16, 8):
        if block_rows % s == 0:
            return s
    return block_rows


def _make_upsample_kernel(chunk_rows, n_chunks, precision):
    """Kernel mapping a (BR, W) input block to a (2*BR, 2*W) output block."""

    def kernel(l_ref, r_ref, x_ref, o_ref):
        L = l_ref[...]          # (2*S, S)  0/1 row-replication matrix (resident)
        R = r_ref[...]          # (W, 2*W)  0/1 column-replication matrix (resident)
        cdt = L.dtype

        def process(r0):
            xc = x_ref[pl.ds(r0, chunk_rows), :].astype(cdt)           # (S, W)
            t = jnp.dot(xc, R, precision=precision,
                        preferred_element_type=cdt)                    # (S, 2W)
            y = jnp.dot(L, t, precision=precision,
                        preferred_element_type=cdt)                    # (2S, 2W)
            o_ref[pl.ds(2 * r0, 2 * chunk_rows), :] = y.astype(o_ref.dtype)

        if n_chunks == 1:
            process(0)
        else:
            def body(i, carry):
                process(pl.multiple_of(i * chunk_rows, chunk_rows))
                return carry
            jax.lax.fori_loop(0, n_chunks, body, 0)

    return kernel


def yolo_upsample(x):
    """nn.Upsample(scale_factor=2, mode='nearest') on an NCHW tensor."""
    N, C, H, W = x.shape
    total_rows = N * C * H
    out_dtype = x.dtype

    # Compute dtype: keep bf16/f32 native; everything else goes through f32.
    # TODO(synk): integer feature maps are only exact up to 2**24 on this path.
    if x.dtype in (jnp.dtype(jnp.bfloat16), jnp.dtype(jnp.float32)):
        cdt = jnp.dtype(x.dtype)
    else:
        cdt = jnp.dtype(jnp.float32)
    precision = (jax.lax.Precision.HIGHEST
                 if cdt == jnp.dtype(jnp.float32) else None)

    block_rows = _choose_block_rows(total_rows, W, jnp.dtype(x.dtype).itemsize)
    chunk_rows = _choose_chunk_rows(block_rows)
    n_chunks = block_rows // chunk_rows
    grid = (pl.cdiv(total_rows, block_rows),)

    # 0/1 replication matrices, built once (outside the kernel) and kept
    # resident across all grid steps via constant index_maps.
    s = chunk_rows
    L = (jnp.arange(2 * s)[:, None] // 2 == jnp.arange(s)[None, :]).astype(cdt)
    R = (jnp.arange(W)[:, None] == jnp.arange(2 * W)[None, :] // 2).astype(cdt)

    x2 = x.reshape(total_rows, W)

    kernel = _make_upsample_kernel(chunk_rows, n_chunks, precision)

    out2 = pl.pallas_call(
        kernel,
        out_shape=jax.ShapeDtypeStruct((2 * total_rows, 2 * W), out_dtype),
        grid=grid,
        in_specs=[
            pl.BlockSpec((2 * s, s), lambda i: (0, 0)),       # L: resident
            pl.BlockSpec((W, 2 * W), lambda i: (0, 0)),       # R: resident
            pl.BlockSpec((block_rows, W), lambda i: (i, 0)),  # input rows
        ],
        out_specs=pl.BlockSpec((2 * block_rows, 2 * W), lambda i: (i, 0)),
        compiler_params=pltpu.CompilerParams(
            dimension_semantics=("parallel",),
            vmem_limit_bytes=32 * 1024 * 1024,
        ),
    )(L, R, x2)

    return out2.reshape(N, C, 2 * H, 2 * W)


if __name__ == "__main__":
    # YoloUpsample has no learnable parameters (register_weights is a no-op).
    key = jax.random.PRNGKey(0)
    N, C, H, W = 2, 4, 16, 16
    x = jax.random.normal(key, (N, C, H, W), dtype=jnp.float32)

    y = jax.block_until_ready(jax.jit(yolo_upsample)(x))

    # Reference: nearest-neighbor 2x upsample on NCHW, as nn.Upsample computes.
    y_ref = jnp.repeat(jnp.repeat(x, 2, axis=2), 2, axis=3)

    assert y.shape == (N, C, 2 * H, 2 * W), y.shape
    assert y.dtype == x.dtype
    assert jnp.allclose(y, y_ref, rtol=0.0, atol=1e-6), float(
        jnp.max(jnp.abs(y - y_ref)))

    print("KERNEL_OK")
</pallas_src>

<mosaic_0001>
module attributes {stable_mosaic.version = 11 : i64} {
  func.func @kernel(%arg0: i32, %arg1: memref<128x64xf32, #tpu.memory_space<vmem>>, %arg2: memref<16x32xf32, #tpu.memory_space<vmem>>, %arg3: memref<64x16xf32, #tpu.memory_space<vmem>>, %arg4: memref<128x32xf32, #tpu.memory_space<vmem>>) attributes {dimension_semantics = [#tpu.dimension_semantics<parallel>], iteration_bounds = array<i64: 2>, scalar_prefetch = 0 : i64, scratch_operands = 0 : i64, tpu.core_type = #tpu.core_type<tc>, window_params = [{pipeline_mode = #tpu.pipeline_mode<synchronous>, transform_indices = @transform_0, window_bounds = array<i64: 128, 64>}, {pipeline_mode = #tpu.pipeline_mode<synchronous>, transform_indices = @transform_1, window_bounds = array<i64: 16, 32>}, {transform_indices = @transform_2, window_bounds = array<i64: 64, 16>}, {transform_indices = @transform_3, window_bounds = array<i64: 128, 32>}]} {
    %c0 = arith.constant 0 : index
    %c0_0 = arith.constant 0 : index
    %0 = vector.load %arg1[%c0, %c0_0] : memref<128x64xf32, #tpu.memory_space<vmem>>, vector<128x64xf32>
    %c0_1 = arith.constant 0 : index
    %c0_2 = arith.constant 0 : index
    %1 = vector.load %arg2[%c0_1, %c0_2] : memref<16x32xf32, #tpu.memory_space<vmem>>, vector<16x32xf32>
    %c0_3 = arith.constant 0 : index
    %c0_4 = arith.constant 0 : index
    %2 = vector.load %arg3[%c0_3, %c0_4] : memref<64x16xf32, #tpu.memory_space<vmem>>, vector<64x16xf32>
    %cst = arith.constant dense<0.000000e+00> : vector<64x32xf32>
    %3 = tpu.matmul %2, %1, %cst {dimension_numbers = #tpu.dot_dimension_numbers<[1], [0], [0], [1], [0, 0, 1, 1], [], []>, precision = #tpu.contract_precision<fp32>} : vector<64x16xf32>, vector<16x32xf32>, vector<64x32xf32> -> vector<64x32xf32>
    %cst_5 = arith.constant dense<0.000000e+00> : vector<128x32xf32>
    %4 = tpu.matmul %0, %3, %cst_5 {dimension_numbers = #tpu.dot_dimension_numbers<[1], [0], [0], [1], [0, 0, 1, 1], [], []>, precision = #tpu.contract_precision<fp32>} : vector<128x64xf32>, vector<64x32xf32>, vector<128x32xf32> -> vector<128x32xf32>
    %c0_6 = arith.constant 0 : index
    %c0_7 = arith.constant 0 : index
    %5 = vector.load %arg4[%c0_6, %c0_7] : memref<128x32xf32, #tpu.memory_space<vmem>>, vector<128x32xf32>
    tpu.vector_store %arg4[%c0_6, %c0_7], %4 {strides = array<i32>} : memref<128x32xf32, #tpu.memory_space<vmem>>, vector<128x32xf32>,
    return
  }
  func.func @transform_0(%arg0: i32) -> (i32, i32) {
    %c0_i32 = arith.constant 0 : i32
    %c0_i32_0 = arith.constant 0 : i32
    %c0_i32_1 = arith.constant 0 : i32
    return %c0_i32, %c0_i32_0 : i32, i32
  }
  func.func @transform_1(%arg0: i32) -> (i32, i32) {
    %c0_i32 = arith.constant 0 : i32
    %c0_i32_0 = arith.constant 0 : i32
    %c0_i32_1 = arith.constant 0 : i32
    return %c0_i32, %c0_i32_0 : i32, i32
  }
  func.func @transform_2(%arg0: i32) -> (i32, i32) {
    %c0_i32 = arith.constant 0 : i32
    %c0_i32_0 = arith.constant 0 : i32
    return %arg0, %c0_i32 : i32, i32
  }
  func.func @transform_3(%arg0: i32) -> (i32, i32) {
    %c0_i32 = arith.constant 0 : i32
    %c0_i32_0 = arith.constant 0 : i32
    return %arg0, %c0_i32 : i32, i32
  }
}

</mosaic_0001>

<bundles_post_ra>
// kernel: yolo_upsample.1
= control target key start
LH: loop header
LB: loop body
LE: loop exit
PB: predicated region body
PF: predicated region fallthrough
CT: control target
= control target key end

     0   :  { %8 = vsyncpa [#allocation3], 0  ;;  %s3915_s0 = inlined_call_operand.vmem [shape: f32[128,64], index: 0, kind: input, shape index: {}]   ;;  %s3916_s1 = inlined_call_operand.vmem [shape: f32[16,32], index: 1, kind: input, shape index: {}]   ;;  %s3917_s2 = inlined_call_operand.vmem [shape: f32[128,16], index: 2, kind: input, shape index: {}]   ;;  %s3918_s3 = inlined_call_operand.hbm [shape: f32[256,32], index: 3, kind: output, shape index: {}]  }
   0x1   :  { %10 = vsyncpa [#allocation3 + $0x1], 0  ;;  %s3236_s12 = smov 0   ;;  %s3238_s13 = smov 0  }
   0x2   :  { %s3240_s14 = smov 0   ;;  %s3242_s15 = smov 0  }
   0x3 LB: > { %s3257_s16 = sadd.s32 4294967295, %s3211_s15   ;;  %s2307_s17 = sadd.s32 4294967294, %s3211_s15   ;;  %s3211_s15 = sphi %s3242_s15, %s3930_s15   ;;  %s3207_s14 = sphi %s3240_s14, %s3929_s14   ;;  %s3203_s13 = sphi %s3238_s13, %s3928_s13   ;;  %s3199_s12 = sphi %s3236_s12, %s3927_s12  }
   0x4   : > { %s3261_s18 = sadd.s32 1, %s3211_s15   ;;  %s91_s19 = sadd.s32 1, %s3207_s14 }
   0x5   : > { %s88_s20 = ssub.s32 %s3211_s15, %s3261_s18  ;;  %p101_p0 = scmp.ne.s32.totalorder %s3207_s14, %s3203_s13 }
   0x6   : > { %p89_p1 = scmp.eq.s32.totalorder %s88_s20, 0  ;;  %p102_p2 = scmp.eq.s32.totalorder %s3257_s16, 1 }
   0x7   : > { %p107_p3 = scmp.ne.s32.totalorder %s3203_s13, %s3199_s12  ;;  %p108_p4 = scmp.eq.s32.totalorder %s2307_s17, 1 }
   0x8   : > { %s3272_s21 = scalar_select %p89_p1, %s3207_s14, %s91_s19  }
   0x9   : > { %p3274_p5 = por %p102_p2, %p101_p0  ;;  %p3278_p6 = por %p108_p4, %p107_p3 }
   0xa   : > { %p2310_p7 = scmp.ge.s32.totalorder %s3211_s15, 1  ;;  %p141_p8 = scmp.lt.s32.totalorder %s3211_s15, 3 }
   0xc   : > { %p142_p9 = pnand %p2310_p7, %p141_p8 }
   0xd   : > { %v188_v0 = vld [vmem:[%s3916_s1] sm:$0xff] (!%p142_p9)  ;;  %v189_v1 = vld [vmem:[%s3916_s1 + $0x8] sm:$0xff] (!%p142_p9)  ;;  %s2312_s28 = sshll.u32 (!%p142_p9), %s3257_s16, 3  ;;  %vm198_vm0 = vcmask (!%p142_p9), 130048   ;;  %vm983_vm1 = vcmask (!%p142_p9), 523264   ;;  %vm2214_vm2 = vcmask (!%p142_p9), 261120  }
   0xe   : > { %145 = sbr.rel (%p142_p9) target bundleno = 724 (0x2d4), region = 32  ;;  %v224_v2 = vand.u32 (!%p142_p9), 4294901760, %v188_v0  ;;  %v227_v3 = vand.u32 (!%p142_p9), 4294901760, %v189_v1  ;;  %p166_p10 = scmp.lt.s32.totalorder (!%p142_p9), %s2312_s28, 15 }
   0xf   : > { %s3213_s11 = smov (!%p142_p9), [#allocation2]  }
  0x10   : > { %v3291_v4 = vpack.c.bf16 (!%p142_p9), %v227_v3, %v224_v2  ;;  %v3293_v5 = vsub.f32 (!%p142_p9), %v188_v0, %v224_v2  ;;  %v3295_v6 = vsub.f32 (!%p142_p9), %v189_v1, %v227_v3  ;;  %s3153_s17 = sshll.u32 (!%p142_p9), %s3213_s11, 4  ;;  %s3154_s17 = int_to_ptr.vmem [resolvable:$false] %s3153_s17 }
  0x11   : > { %s3155_s19 = scalar_lea.vmem (!%p142_p9), %s3154_s17, 4096 }
  0x12   : > { %2861 = vmatprep.subr.bf16.mxu0 (!%p142_p9), %v3291_v4  ;;  %v373_v7 = vand.u32 (!%p142_p9), 4294901760, %v3293_v5  ;;  %v380_v8 = vand.u32 (!%p142_p9), 4294901760, %v3295_v6  ;;  %v2868_v61 = vpack.c.bf16 (!%p142_p9), %v3295_v6, %v3293_v5 }
  0x13   : > { %2863 = vmatpush3.bf16.msra.mxu0 (!%p142_p9), %v3291_v4 }
  0x14   : > { %v374_v11 = vsub.f32 (!%p142_p9), %v3293_v5, %v373_v7  ;;  %v381_v12 = vsub.f32 (!%p142_p9), %v3295_v6, %v380_v8 }
  0x15   : > { %s3932_s28 = smov (!%p166_p10, %s2312_s28), 15 }
  0x16   : > { %s2313_s29 = sshll.u32 %s3932_s28, 3  ;;  %v375_v22 = vand.u32 4294901760, %v374_v11  ;;  %v382_v23 = vand.u32 4294901760, %v381_v12  ;;  %v2876_v12 = vpack.c.bf16 %v380_v8, %v373_v7 }
  0x17   : > { %s169_s5 = scalar_lea.vmem %s3917_s2, %s2313_s29  ;;  %s162_s29 = sand.u32 1, %s3203_s13  }
  0x18   : > { %v190_v9 = vld [vmem:[%s169_s5] sm:$0xff]  ;;  %v191_v10 = vld [vmem:[%s169_s5 + $0x8] sm:$0xff]  ;;  %v192_v13 = vld [vmem:[%s169_s5 + $0x10] sm:$0xff]  ;;  %v2864_v31 = vpack.c.bf16 %v382_v23, %v375_v22  ;;  %s2311_s30 = sshll.u32 %s162_s29, 7 }
  0x19   : > { %v200_v14 = vsel %vm198_vm0, %v190_v9, 0  ;;  %v203_v15 = vsel %vm198_vm0, %v191_v10, 0  ;;  %v206_v16 = vsel %vm198_vm0, %v192_v13, 0  ;;  %v193_v17 = vld [vmem:[%s169_s5 + $0x18] sm:$0xff]  ;;  %v194_v18 = vld [vmem:[%s169_s5 + $0x20] sm:$0xff]  ;;  %v195_v19 = vld [vmem:[%s169_s5 + $0x28] sm:$0xff] }
  0x1a   : > { %v3313_v20 = vand.u32 4294901760, %v200_v14  ;;  %v3315_v21 = vand.u32 4294901760, %v203_v15  ;;  %v196_v24 = vld [vmem:[%s169_s5 + $0x30] sm:$0xff]  ;;  %v3317_v25 = vand.u32 4294901760, %v206_v16  ;;  %v209_v26 = vsel %vm198_vm0, %v193_v17, 0  ;;  %v197_v33 = vld [vmem:[%s169_s5 + $0x38] sm:$0xff]  ;;  %2865 = vmatprep.subr.bf16.mxu0 %v2864_v31 }
  0x1b   : > { %v212_v27 = vsel %vm198_vm0, %v194_v18, 0  ;;  %v215_v28 = vsel %vm198_vm0, %v195_v19, 0  ;;  %v3328_v32 = vand.u32 4294901760, %v209_v26  ;;  %v218_v37 = vsel %vm198_vm0, %v196_v24, 0  ;;  %v176_v22 = vld [vmem:[%s3915_s0 + $0x20] sm:$0xff]  ;;  %v177_v23 = vld [vmem:[%s3915_s0 + $0x28] sm:$0xff] }
  0x1c   : > { %v3323_v29 = vsub.f32 %v200_v14, %v3313_v20  ;;  %v3326_v30 = vsub.f32 %v203_v15, %v3315_v21  ;;  %v3331_v34 = vsub.f32 %v206_v16, %v3317_v25  ;;  %v3333_v35 = vand.u32 4294901760, %v212_v27  ;;  %v173_v15 = vld [vmem:[%s3915_s0 + $0x8] sm:$0xff]  ;;  %v178_v24 = vld [vmem:[%s3915_s0 + $0x30] sm:$0xff]  ;;  %s3825_s4 = scalar_lea.vmem [#allocation2], %s2311_s30  ;;  %s2319_s5 = sshll.u32 %s3257_s16, 11 }
  0x1d   : > { %v3335_v36 = vand.u32 4294901760, %v215_v28  ;;  %v3341_v40 = vsub.f32 %v209_v26, %v3328_v32  ;;  %v3343_v41 = vand.u32 4294901760, %v218_v37  ;;  %v221_v45 = vsel %vm198_vm0, %v197_v33, 0  ;;  %v179_v26 = vld [vmem:[%s3915_s0 + $0x38] sm:$0xff]  ;;  %s2245_s6 = sshll.u32 %s3825_s4, 4  ;;  %s3863_s9 = scalar_lea.hbm %s3918_s3, %s2319_s5  ;;  %s3865_s6 = int_to_ptr.vmem [resolvable:$true] %s2245_s6 }
  0x1e   : > { %v292_v38 = vand.u32 4294901760, %v3323_v29  ;;  %v302_v39 = vand.u32 4294901760, %v3326_v30  ;;  %v312_v42 = vand.u32 4294901760, %v3331_v34  ;;  %v3347_v43 = vsub.f32 %v212_v27, %v3333_v35  ;;  %v180_v27 = vld [vmem:[%s3915_s0 + $0x40] sm:$0xff]  ;;  %s3874_s16 = scalar_lea.sflag [#allocation3], %s162_s29  ;;  %s3149_s10 = scalar_lea.vmem %s3865_s6, 2048 }
  0x1f   : > { %v3350_v44 = vsub.f32 %v215_v28, %v3335_v36  ;;  %v322_v48 = vand.u32 4294901760, %v3341_v40  ;;  %v351_v49 = vsub.f32 %v218_v37, %v3343_v41  ;;  %v3364_v53 = vand.u32 4294901760, %v221_v45  ;;  %p3150_p11 = scmp.ne.s32.totalorder %s3865_s6, %s3149_s10  ;;  %p3156_p0 = scmp.lt.s32.totalorder %s3865_s6, %s3154_s17 }
  0x20   : > { %v293_v46 = vsub.f32 %v3323_v29, %v292_v38  ;;  %v303_v47 = vsub.f32 %v3326_v30, %v302_v39  ;;  %v313_v50 = vsub.f32 %v3331_v34, %v312_v42  ;;  %v332_v51 = vand.u32 4294901760, %v3347_v43  ;;  %p3157_p1 = scmp.lt.s32.totalorder %s3155_s19, %s3149_s10 }
  0x21   : > { %v342_v52 = vand.u32 4294901760, %v3350_v44  ;;  %v323_v56 = vsub.f32 %v3341_v40, %v322_v48  ;;  %v352_v57 = vand.u32 4294901760, %v351_v49  ;;  %v361_v60 = vsub.f32 %v221_v45, %v3364_v53  ;;  %p3151_p12 = pnand %p3150_p11, %p3274_p5 }
  0x22   : > { %v294_v54 = vand.u32 4294901760, %v293_v46  ;;  %v304_v55 = vand.u32 4294901760, %v303_v47  ;;  %v314_v58 = vand.u32 4294901760, %v313_v50  ;;  %v333_v59 = vsub.f32 %v3347_v43, %v332_v51  ;;  %p3158_p2 = por %p3157_p1, %p3156_p0 }
  0x23   : > { %v324_v62 = vand.u32 4294901760, %v323_v56  ;;  %v343_v63 = vsub.f32 %v3350_v44, %v342_v52  ;;  %v362_v0 = vand.u32 4294901760, %v361_v60  ;;  %v353_v2 = vsub.f32 %v351_v49, %v352_v57  ;;  %p3152_p13 = pneg %p3151_p12 }
  0x24   : > { %2528 = vmatprep.mubr.f32.mxu0 %v294_v54  ;;  %v334_v1 = vand.u32 4294901760, %v333_v59  ;;  %v988_v16 = vsel %vm983_vm1, %v173_v15, 0  ;;  %v3469_v33 = vsel %vm983_vm1, %v178_v24, 0  ;;  %v3475_v37 = vsel %vm983_vm1, %v180_v27, 0 }
  0x25   : > { %2529 = vmatmul.mubr.f32.vlgmr.msra.gmra.mrb[0].mxu0 %v304_v55  ;;  %v344_v3 = vand.u32 4294901760, %v343_v63  ;;  %v363_v9 = vsub.f32 %v361_v60, %v362_v0  ;;  %v354_v10 = vand.u32 4294901760, %v353_v2  ;;  %v3432_v17 = vand.u32 4294901760, %v988_v16  ;;  %p3159_p3 = pnand %p3158_p2, %p3152_p13 }
  0x26   : > { %2867 = vmatpush3.bf16.msra.mxu0 %v2864_v31  ;;  %2531 = vmatprep.mubr.f32.mxu0 %v314_v58  ;;  %v997_v31 = vsel %vm983_vm1, %v176_v22, 0  ;;  %v3490_v46 = vand.u32 4294901760, %v3469_v33 }
  0x27   : > { %2869 = vmatprep.subr.bf16.mxu0 %v2868_v61  ;;  %v364_v11 = vand.u32 4294901760, %v363_v9  ;;  %v3435_v18 = vsub.f32 %v988_v16, %v3432_v17 }
  0x29   : > { %2532 = vmatmul.mubr.f32.gmra.mrb[2].mxu0 %v324_v62  ;;  %v1117_v19 = vand.u32 4294901760, %v3435_v18 }
  0x2a   : > { %2534 = vmatprep.mubr.f32.mxu0 %v334_v1 }
  0x2d   : > { %2535 = vmatmul.mubr.f32.gmra.mrb[4].mxu0 %v344_v3 }
  0x2e   : > { %2537 = vmatprep.mubr.f32.mxu0 %v354_v10 }
  0x31   : > { %2538 = vmatmul.mubr.f32.gmra.mrb[6].mxu0 %v364_v11 }
  0x32   : > { %2544 = vmatprep.mubr.f32.mxu0 %v3313_v20 }
  0x35   : > { %2545 = vmatmul.mubr.f32.vlgmr.msra.gmra.mrb[0].mxu0 %v3315_v21 }
  0x36   : > { %2871 = vmatpush3.bf16.msra.mxu0 %v2868_v61  ;;  %2547 = vmatprep.mubr.f32.mxu0 %v3317_v25 }
  0x37   : > { %2873 = vmatprep.subr.bf16.mxu0 %v3291_v4 }
  0x39   : > { %2548 = vmatmul.mubr.f32.gmra.mrb[2].mxu0 %v3328_v32 }
  0x3a   : > { %2550 = vmatprep.mubr.f32.mxu0 %v3333_v35 }
  0x3d   : > { %2551 = vmatmul.mubr.f32.gmra.mrb[4].mxu0 %v3335_v36 }
  0x3e   : > { %2553 = vmatprep.mubr.f32.mxu0 %v3343_v41 }
  0x41   : > { %2554 = vmatmul.mubr.f32.gmra.mrb[6].mxu0 %v3364_v53 }
  0x42   : > { %2560 = vmatprep.mubr.f32.mxu0 %v3323_v29 }
  0x45   : > { %2561 = vmatmul.mubr.f32.vlgmr.msra.gmra.mrb[0].mxu0 %v3326_v30 }
  0x46   : > { %2875 = vmatpush3.bf16.msra.mxu0 %v3291_v4  ;;  %2563 = vmatprep.mubr.f32.mxu0 %v3331_v34 }
  0x47   : > { %2877 = vmatprep.subr.bf16.mxu0 %v2876_v12 }
  0x49   : > { %2564 = vmatmul.mubr.f32.gmra.mrb[2].mxu0 %v3341_v40 }
  0x4a   : > { %2566 = vmatprep.mubr.f32.mxu0 %v3347_v43 }
  0x4d   : > { %2567 = vmatmul.mubr.f32.gmra.mrb[4].mxu0 %v3350_v44  ;;  %v3485_v44 = vand.u32 4294901760, %v997_v31 }
  0x4e   : > { %2569 = vmatprep.mubr.f32.mxu0 %v351_v49 }
  0x4f   : > { %v3514_v63 = vsub.f32 %v997_v31, %v3485_v44 }
  0x51   : > { %2570 = vmatmul.mubr.f32.gmra.mrb[6].mxu0 %v361_v60 }
  0x52   : > { %2576 = vmatprep.mubr.f32.mxu0 %v292_v38 }
  0x55   : > { %2577 = vmatmul.mubr.f32.vlgmr.msra.gmra.mrb[0].mxu0 %v302_v39 }
  0x56   : > { %2879 = vmatpush3.bf16.msra.mxu0 %v2876_v12  ;;  %2579 = vmatprep.mubr.f32.mxu0 %v312_v42  ;;  %v181_v42 = vld [vmem:[%s3915_s0 + $0x48] sm:$0xff] }
  0x57   : > { %2881 = vmatprep.subr.bf16.mxu0 %v3291_v4  ;;  %v3501_v55 = vsel %vm983_vm1, %v181_v42, 0 }
  0x59   : > { %2580 = vmatmul.mubr.f32.gmra.mrb[2].mxu0 %v322_v48 }
  0x5a   : > { %2582 = vmatprep.mubr.f32.mxu0 %v332_v51  ;;  %v3498_v51 = vand.u32 4294901760, %v3475_v37 }
  0x5d   : > { %2583 = vmatmul.mubr.f32.gmra.mrb[4].mxu0 %v342_v52 }
  0x5e   : > { %2585 = vmatprep.mubr.f32.mxu0 %v352_v57 }
  0x61   : > { %2586 = vmatmul.mubr.f32.gmra.mrb[6].mxu0 %v362_v0 }
  0x62   : > { %2592 = vmatprep.mubr.f32.mxu0 %v3313_v20 }
  0x65   : > { %2593 = vmatmul.mubr.f32.vlgmr.msra.gmra.mrb[0].mxu0 %v3315_v21 }
  0x66   : > { %2883 = vmatpush3.bf16.msra.mxu0 %v3291_v4  ;;  %2595 = vmatprep.mubr.f32.mxu0 %v3317_v25  ;;  %v172_v4 = vld [vmem:[%s3915_s0] sm:$0xff] }
  0x67   : > { %v985_v5 = vsel %vm983_vm1, %v172_v4, 0 }
  0x68   : > { %v3418_v6 = vand.u32 4294901760, %v985_v5 }
  0x69   : > { %2596 = vmatmul.mubr.f32.gmra.mrb[2].mxu0 %v3328_v32 }
  0x6a   : > { %2598 = vmatprep.mubr.f32.mxu0 %v3333_v35  ;;  %v3421_v7 = vsub.f32 %v985_v5, %v3418_v6  ;;  %2676 = vmatprep.mubr.f32.mxu1 %v3418_v6 }
  0x6c   : > { %v1107_v8 = vand.u32 4294901760, %v3421_v7 }
  0x6d   : > { %2599 = vmatmul.mubr.f32.gmra.mrb[4].mxu0 %v3335_v36 }
  0x6e   : > { %2601 = vmatprep.mubr.f32.mxu0 %v3343_v41  ;;  %v1108_v13 = vsub.f32 %v3421_v7, %v1107_v8 }
  0x70   : > { %v1109_v14 = vand.u32 4294901760, %v1108_v13 }
  0x71   : > { %2602 = vmatmul.mubr.f32.gmra.mrb[6].mxu0 %v3364_v53 }
  0x72   : > { %2608 = vmatprep.mubr.f32.mxu0 %v3313_v20  ;;  %v174_v20 = vld [vmem:[%s3915_s0 + $0x10] sm:$0xff] }
  0x73   : > { %v991_v28 = vsel %vm983_vm1, %v174_v20, 0 }
  0x74   : > { %v3478_v40 = vand.u32 4294901760, %v991_v28 }
  0x75   : > { %2609 = vmatmul.mubr.f32.vlgmr.msra.gmra.mrb[0].mxu0 %v3315_v21  ;;  %v175_v21 = vld [vmem:[%s3915_s0 + $0x18] sm:$0xff] }
  0x76   : > { %2611 = vmatprep.mubr.f32.mxu0 %v3317_v25  ;;  %v3456_v25 = vsub.f32 %v3435_v18, %v1117_v19  ;;  %v994_v29 = vsel %vm983_vm1, %v175_v21, 0  ;;  %v3504_v56 = vsub.f32 %v991_v28, %v3478_v40 }
  0x78   : > { %v1119_v39 = vand.u32 4294901760, %v3456_v25  ;;  %v1127_v0 = vand.u32 4294901760, %v3504_v56  ;;  %v3599_v25 = vsub.f32 %v3475_v37, %v3498_v51 }
  0x79   : > { %2612 = vmatmul.mubr.f32.gmra.mrb[2].mxu0 %v3328_v32  ;;  %v1000_v32 = vsel %vm983_vm1, %v177_v23, 0 }
  0x7a   : > { %2614 = vmatprep.mubr.f32.mxu0 %v3333_v35  ;;  %v3487_v45 = vand.u32 4294901760, %v1000_v32  ;;  %v3532_v24 = vsub.f32 %v3504_v56, %v1127_v0 }
  0x7c   : > { %v3522_v13 = vsub.f32 %v1000_v32, %v3487_v45 }
  0x7d   : > { %2615 = vmatmul.mubr.f32.gmra.mrb[4].mxu0 %v3335_v36  ;;  %v3472_v36 = vsel %vm983_vm1, %v179_v26, 0 }
  0x7e   : > { %2617 = vmatprep.mubr.f32.mxu0 %v3343_v41  ;;  %v3480_v41 = vand.u32 4294901760, %v994_v29  ;;  %v3495_v50 = vand.u32 4294901760, %v3472_v36 }
  0x80   : > { %v3510_v60 = vsub.f32 %v994_v29, %v3480_v41 }
  0x81   : > { %2618 = vmatmul.mubr.f32.gmra.mrb[6].mxu0 %v3364_v53 }
  0x82   : > { %2636 = vmatprep.mubr.f32.mxu0 %v1109_v14  ;;  %v1137_v23 = vand.u32 4294901760, %v3510_v60 }
 0x148   : > { %v2610_v30 = vpop.f32.mrb[0].mxu0 }
 0x149   : > { %v1036_v34 = vand.u32 4294901760, %v2610_v30  ;;  %v937_v35 = vpop.f32.mrb[1].mxu0 }
 0x14a   : > { %v1033_v38 = vand.u32 4294901760, %v937_v35 }
 0x14b   : > { %v1274_v43 = vsub.f32 %v2610_v30, %v1036_v34 }
 0x14c   : > { %v3492_v47 = vpack.c.bf16 %v1036_v34, %v1033_v38  ;;  %v1267_v48 = vsub.f32 %v937_v35, %v1033_v38  ;;  %v2613_v49 = vpop.f32.mrb[2].mxu0 }
 0x14d   : > { %v1042_v52 = vand.u32 4294901760, %v2613_v49  ;;  %v949_v53 = vpop.f32.mrb[3].mxu0  ;;  %v1275_v54 = vand.u32 4294901760, %v1274_v43 }
 0x14e   : > { %v1039_v57 = vand.u32 4294901760, %v949_v53  ;;  %2885 = vmatprep.subr.bf16.mxu0 %v3492_v47  ;;  %v1268_v58 = vand.u32 4294901760, %v1267_v48  ;;  %v3507_v59 = vpack.c.bf16 %v1274_v43, %v1267_v48 }
 0x14f   : > { %v1288_v61 = vsub.f32 %v2613_v49, %v1042_v52  ;;  %2887 = vmatpush3.bf16.msra.mxu0 %v3492_v47  ;;  %v1276_v62 = vsub.f32 %v1274_v43, %v1275_v54 }
 0x150   : > { %v3517_v1 = vpack.c.bf16 %v1042_v52, %v1039_v57  ;;  %v1281_v2 = vsub.f32 %v949_v53, %v1039_v57  ;;  %v2616_v3 = vpop.f32.mrb[4].mxu0  ;;  %v1269_v9 = vsub.f32 %v1267_v48, %v1268_v58  ;;  %v3519_v10 = vpack.c.bf16 %v1275_v54, %v1268_v58 }
 0x151   : > { %v1289_v11 = vand.u32 4294901760, %v1288_v61  ;;  %v1048_v12 = vand.u32 4294901760, %v2616_v3  ;;  %v961_v4 = vpop.f32.mrb[5].mxu0  ;;  %v1277_v5 = vand.u32 4294901760, %v1276_v62  ;;  %v3543_v54 = vand.u32 4294901760, %v3501_v55 }
 0x152   : > { %v1282_v14 = vand.u32 4294901760, %v1281_v2  ;;  %v1045_v15 = vand.u32 4294901760, %v961_v4  ;;  %2889 = vmatprep.subr.bf16.mxu0 %v3517_v1  ;;  %v1270_v16 = vand.u32 4294901760, %v1269_v9  ;;  %v3525_v20 = vpack.c.bf16 %v1288_v61, %v1281_v2 }
 0x153   : > { %v1290_v21 = vsub.f32 %v1288_v61, %v1289_v11  ;;  %v1302_v22 = vsub.f32 %v2616_v3, %v1048_v12  ;;  %2891 = vmatpush3.bf16.msra.mxu0 %v3517_v1  ;;  %v1138_v57 = vsub.f32 %v3510_v60, %v1137_v23  ;;  %v182_v3 = vld [vmem:[%s3915_s0 + $0x50] sm:$0xff] }
 0x154   : > { %v1283_v26 = vsub.f32 %v1281_v2, %v1282_v14  ;;  %v3534_v27 = vpack.c.bf16 %v1048_v12, %v1045_v15  ;;  %v1295_v28 = vsub.f32 %v961_v4, %v1045_v15  ;;  %v2619_v29 = vpop.f32.mrb[6].mxu0  ;;  %v2900_v30 = vpack.c.bf16 %v1277_v5, %v1270_v16  ;;  %v183_v16 = vld [vmem:[%s3915_s0 + $0x58] sm:$0xff] }
 0x155   : > { %v1303_v31 = vand.u32 4294901760, %v1302_v22  ;;  %v1054_v32 = vand.u32 4294901760, %v2619_v29  ;;  %v973_v34 = vpop.f32.mrb[7].mxu0  ;;  %v1291_v35 = vand.u32 4294901760, %v1290_v21  ;;  %v3536_v38 = vpack.c.bf16 %v1289_v11, %v1282_v14 }
 0x156   : > { %v1296_v42 = vand.u32 4294901760, %v1295_v28  ;;  %v1051_v43 = vand.u32 4294901760, %v973_v34  ;;  %2893 = vmatprep.subr.bf16.mxu0 %v3534_v27  ;;  %2901 = vmatprep.subr.bf16.mxu1 %v2900_v30  ;;  %v1284_v48 = vand.u32 4294901760, %v1283_v26  ;;  %v3539_v49 = vpack.c.bf16 %v1302_v22, %v1295_v28 }
 0x157   : > { %v1304_v52 = vsub.f32 %v1302_v22, %v1303_v31  ;;  %v1316_v53 = vsub.f32 %v2619_v29, %v1054_v32  ;;  %2895 = vmatpush3.bf16.msra.mxu0 %v3534_v27  ;;  %2903 = vmatpush3.bf16.msra.mxu1 %v2900_v30  ;;  %v1147_v4 = vand.u32 4294901760, %v3514_v63  ;;  %v1157_v21 = vand.u32 4294901760, %v3522_v13 }
 0x158   : > { %v1297_v58 = vsub.f32 %v1295_v28, %v1296_v42  ;;  %v3548_v61 = vpack.c.bf16 %v1054_v32, %v1051_v43  ;;  %v1309_v62 = vsub.f32 %v973_v34, %v1051_v43  ;;  %v2904_v2 = vpack.c.bf16 %v1291_v35, %v1284_v48  ;;  %v185_v48 = vld [vmem:[%s3915_s0 + $0x68] sm:$0xff] }
 0x159   : > { %v1317_v9 = vand.u32 4294901760, %v1316_v53  ;;  %v1305_v11 = vand.u32 4294901760, %v1304_v52  ;;  %v3553_v12 = vpack.c.bf16 %v1303_v31, %v1296_v42  ;;  %v1015_v26 = vsel %vm983_vm1, %v182_v3, 0 }
 0x15a   : > { %v1310_v5 = vand.u32 4294901760, %v1309_v62  ;;  %2897 = vmatprep.subr.bf16.mxu0 %v3548_v61  ;;  %2905 = vmatprep.subr.bf16.mxu1 %v2904_v2  ;;  %v1298_v14 = vand.u32 4294901760, %v1297_v58  ;;  %v3557_v15 = vpack.c.bf16 %v1316_v53, %v1309_v62  ;;  %v3567_v28 = vsub.f32 %v3469_v33, %v3490_v46  ;;  %v184_v33 = vld [vmem:[%s3915_s0 + $0x60] sm:$0xff] }
 0x15b   : > { %v1318_v22 = vsub.f32 %v1316_v53, %v1317_v9  ;;  %2899 = vmatpush3.bf16.msra.mxu0 %v3548_v61  ;;  %2907 = vmatpush3.bf16.msra.mxu1 %v2904_v2  ;;  %v3571_v29 = vsub.f32 %v3472_v36, %v3495_v50  ;;  %v1129_v32 = vand.u32 4294901760, %v3532_v24  ;;  %v1018_v42 = vsel %vm983_vm1, %v183_v16, 0 }
 0x15c   : > { %v1311_v30 = vsub.f32 %v1309_v62, %v1310_v5  ;;  %2965 = vmatprep.subr.bf16.mxu0 %v3492_v47  ;;  %v2908_v31 = vpack.c.bf16 %v1305_v11, %v1298_v14  ;;  %v3575_v34 = vpack.c.bf16 %v1317_v9, %v1310_v5  ;;  %v1148_v36 = vsub.f32 %v3514_v63, %v1147_v4  ;;  %v186_v11 = vld [vmem:[%s3915_s0 + $0x70] sm:$0xff] }
 0x15d   : > { %v1319_v35 = vand.u32 4294901760, %v1318_v22  ;;  %v1167_v43 = vand.u32 4294901760, %v3567_v28  ;;  %v1139_v52 = vand.u32 4294901760, %v1138_v57  ;;  %v1158_v53 = vsub.f32 %v3522_v13, %v1157_v21 }
 0x15e   : > { %2909 = vmatprep.subr.bf16.mxu1 %v2908_v31  ;;  %2637 = vmatmul.mubr.f32.vlgmr.msra.gmra.mrb[8].mxu0 %v1119_v39  ;;  %v1312_v24 = vand.u32 4294901760, %v1311_v30  ;;  %v1177_v58 = vand.u32 4294901760, %v3571_v29  ;;  %v3595_v62 = vand.u32 4294901760, %v1015_v26  ;;  %v3602_v2 = vand.u32 4294901760, %v1018_v42 }
 0x15f   : > { %2911 = vmatpush3.bf16.msra.mxu1 %v2908_v31  ;;  %2967 = vmatpush3.bf16.msra.mxu0 %v3492_v47  ;;  %v1021_v57 = vsel %vm983_vm1, %v184_v33, 0  ;;  %v3607_v3 = vsub.f32 %v3501_v55, %v3543_v54  ;;  %v1024_v9 = vsel %vm983_vm1, %v185_v48, 0  ;;  %v1149_v37 = vand.u32 4294901760, %v1148_v36 }
 0x160   : > { %2969 = vmatprep.subr.bf16.mxu0 %v3517_v1  ;;  %v2912_v39 = vpack.c.bf16 %v1319_v35, %v1312_v24  ;;  %2639 = vmatprep.mubr.f32.mxu0 %v1129_v32  ;;  %v1168_v5 = vsub.f32 %v3567_v28, %v1167_v43  ;;  %v1187_v14 = vand.u32 4294901760, %v3599_v25  ;;  %v3618_v16 = vsub.f32 %v1015_v26, %v3595_v62  ;;  %v187_v32 = vld [vmem:[%s3915_s0 + $0x78] sm:$0xff] }
 0x161   : > { %v1159_v55 = vand.u32 4294901760, %v1158_v53  ;;  %v1178_v22 = vsub.f32 %v3571_v29, %v1177_v58  ;;  %v3919_v30 = vand.u32 4294901760, %v3607_v3  ;;  %v3627_v31 = vand.u32 4294901760, %v1021_v57 }
 0x162   : > { %2913 = vmatprep.subr.bf16.mxu1 %v2912_v39  ;;  %2640 = vmatmul.mubr.f32.gmra.mrb[10].mxu0 %v1139_v52  ;;  %v1027_v26 = vsel %vm983_vm1, %v186_v11, 0  ;;  %v3634_v35 = vsub.f32 %v1018_v42, %v3602_v2  ;;  %v3920_v33 = vand.u32 4294901760, %v3618_v16  ;;  %v3637_v36 = vand.u32 4294901760, %v1024_v9 }
 0x163   : > { %2915 = vmatpush3.bf16.msra.mxu1 %v2912_v39  ;;  %2971 = vmatpush3.bf16.msra.mxu0 %v3517_v1  ;;  %v1169_v24 = vand.u32 4294901760, %v1168_v5  ;;  %v1188_v48 = vsub.f32 %v3599_v25, %v1187_v14  ;;  %v3644_v52 = vsub.f32 %v1021_v57, %v3627_v31  ;;  %v1179_v53 = vand.u32 4294901760, %v1178_v22 }
 0x164   : > { %2917 = vmatprep.subr.bf16.mxu1 %v3507_v59  ;;  %2973 = vmatprep.subr.bf16.mxu0 %v3534_v27  ;;  %v1198_v42 = vsub.f32 %v3607_v3, %v3919_v30  ;;  %v3921_v39 = vand.u32 4294901760, %v3634_v35  ;;  %v3652_v11 = vand.u32 4294901760, %v1027_v26  ;;  %v3658_v57 = vsub.f32 %v1024_v9, %v3637_v36 }
 0x165   : > { %2642 = vmatprep.mubr.f32.mxu0 %v1149_v37  ;;  %v1030_v37 = vsel %vm983_vm1, %v187_v32, 0  ;;  %v1208_v5 = vsub.f32 %v3618_v16, %v3920_v33  ;;  %v1189_v22 = vand.u32 4294901760, %v1188_v48 }
 0x166   : > { %2677 = vmatmul.mubr.f32.vlgmr.msra.gmra.mrb[0].mxu1 %v3432_v17  ;;  %2643 = vmatmul.mubr.f32.gmra.mrb[12].mxu0 %v1159_v55  ;;  %v1227_v55 = vand.u32 4294901760, %v3644_v52  ;;  %v3669_v32 = vand.u32 4294901760, %v1030_v37  ;;  %v1199_v9 = vand.u32 4294901760, %v1198_v42  ;;  %v1218_v30 = vsub.f32 %v3634_v35, %v3921_v39 }
 0x167   : > { %2919 = vmatpush3.bf16.msra.mxu1 %v3507_v59  ;;  %2975 = vmatpush3.bf16.msra.mxu0 %v3534_v27  ;;  %v3666_v59 = vsub.f32 %v1027_v26, %v3652_v11  ;;  %v1237_v33 = vand.u32 4294901760, %v3658_v57  ;;  %v1209_v48 = vand.u32 4294901760, %v1208_v5 }
 0x168   : > { %2921 = vmatprep.subr.bf16.mxu1 %v3525_v20  ;;  %2977 = vmatprep.subr.bf16.mxu0 %v3548_v61 }
 0x169   : > { %2679 = vmatprep.mubr.f32.mxu1 %v3478_v40  ;;  %2645 = vmatprep.mubr.f32.mxu0 %v1169_v24  ;;  %v1247_v26 = vand.u32 4294901760, %v3666_v59  ;;  %v3681_v24 = vsub.f32 %v1030_v37, %v3669_v32  ;;  %v1238_v42 = vsub.f32 %v3658_v57, %v1237_v33 }
 0x16a   : > { %2680 = vmatmul.mubr.f32.gmra.mrb[2].mxu1 %v3480_v41  ;;  %2646 = vmatmul.mubr.f32.gmra.mrb[14].mxu0 %v1179_v53  ;;  %v1228_v53 = vsub.f32 %v3644_v52, %v1227_v55 }
 0x16b   : > { %2923 = vmatpush3.bf16.msra.mxu1 %v3525_v20  ;;  %2979 = vmatpush3.bf16.msra.mxu0 %v3548_v61  ;;  %v1219_v20 = vand.u32 4294901760, %v1218_v30  ;;  %v1257_v39 = vand.u32 4294901760, %v3681_v24  ;;  %v1248_v37 = vsub.f32 %v3666_v59, %v1247_v26  ;;  %v1239_v30 = vand.u32 4294901760, %v1238_v42 }
 0x16c   : > { %2925 = vmatprep.subr.bf16.mxu1 %v3539_v49  ;;  %2682 = vmatprep.mubr.f32.mxu1 %v3485_v44  ;;  %v1229_v5 = vand.u32 4294901760, %v1228_v53 }
 0x16d   : > { %2648 = vmatprep.mubr.f32.mxu0 %v1189_v22  ;;  %v1258_v22 = vsub.f32 %v3681_v24, %v1257_v39 }
 0x16e   : > { %2683 = vmatmul.mubr.f32.gmra.mrb[4].mxu1 %v3487_v45  ;;  %2649 = vmatmul.mubr.f32.gmra.mrb[16].mxu0 %v1199_v9 }
 0x16f   : > { %2927 = vmatpush3.bf16.msra.mxu1 %v3539_v49  ;;  %2685 = vmatprep.mubr.f32.mxu1 %v3490_v46  ;;  %v1249_v49 = vand.u32 4294901760, %v1248_v37  ;;  %v1259_v9 = vand.u32 4294901760, %v1258_v22 }
 0x170   : > { %2929 = vmatprep.subr.bf16.mxu1 %v3557_v15  ;;  %2651 = vmatprep.mubr.f32.mxu0 %v1209_v48 }
 0x172   : > { %2686 = vmatmul.mubr.f32.gmra.mrb[6].mxu1 %v3495_v50  ;;  %2652 = vmatmul.mubr.f32.gmra.mrb[18].mxu0 %v1219_v20 }
 0x173   : > { %2931 = vmatpush3.bf16.msra.mxu1 %v3557_v15  ;;  %2688 = vmatprep.mubr.f32.mxu1 %v3498_v51 }
 0x174   : > { %2933 = vmatprep.subr.bf16.mxu1 %v3492_v47  ;;  %2654 = vmatprep.mubr.f32.mxu0 %v1229_v5 }
 0x176   : > { %2689 = vmatmul.mubr.f32.gmra.mrb[8].mxu1 %v3543_v54  ;;  %2655 = vmatmul.mubr.f32.gmra.mrb[20].mxu0 %v1239_v30 }
 0x177   : > { %2691 = vmatprep.mubr.f32.mxu1 %v3595_v62  ;;  %2657 = vmatprep.mubr.f32.mxu0 %v1249_v49 }
 0x17a   : > { %2692 = vmatmul.mubr.f32.gmra.mrb[10].mxu1 %v3602_v2  ;;  %2658 = vmatmul.mubr.f32.gmra.mrb[22].mxu0 %v1259_v9 }
 0x17b   : > { %2694 = vmatprep.mubr.f32.mxu1 %v3627_v31  ;;  %2836 = vmatprep.mubr.f32.mxu0 %v3418_v6 }
 0x17e   : > { %2695 = vmatmul.mubr.f32.gmra.mrb[12].mxu1 %v3637_v36  ;;  %2837 = vmatmul.mubr.f32.vlgmr.msra.gmra.mrb[24].mxu0 %v3432_v17 }
 0x17f   : > { %2697 = vmatprep.mubr.f32.mxu1 %v3652_v11  ;;  %2839 = vmatprep.mubr.f32.mxu0 %v3478_v40 }
 0x182   : > { %2698 = vmatmul.mubr.f32.gmra.mrb[14].mxu1 %v3669_v32  ;;  %2840 = vmatmul.mubr.f32.gmra.mrb[26].mxu0 %v3480_v41 }
 0x183   : > { %2716 = vmatprep.mubr.f32.mxu1 %v3421_v7  ;;  %2842 = vmatprep.mubr.f32.mxu0 %v3485_v44  ;;  %v3924_v7 = vand.u32 4294901760, %v3607_v3 }
 0x186   : > { %2717 = vmatmul.mubr.f32.vlgmr.msra.gmra.mrb[0].mxu1 %v3435_v18  ;;  %2843 = vmatmul.mubr.f32.gmra.mrb[28].mxu0 %v3487_v45  ;;  %v3926_v18 = vand.u32 4294901760, %v3634_v35 }
 0x187   : > { %2935 = vmatpush3.bf16.msra.mxu1 %v3492_v47  ;;  %2719 = vmatprep.mubr.f32.mxu1 %v3504_v56 }
 0x188   : > { %2937 = vmatprep.subr.bf16.mxu1 %v3517_v1  ;;  %2845 = vmatprep.mubr.f32.mxu0 %v3490_v46 }
 0x18a   : > { %2720 = vmatmul.mubr.f32.gmra.mrb[2].mxu1 %v3510_v60  ;;  %2846 = vmatmul.mubr.f32.gmra.mrb[30].mxu0 %v3495_v50 }
 0x18b   : > { %2939 = vmatpush3.bf16.msra.mxu1 %v3517_v1  ;;  %2722 = vmatprep.mubr.f32.mxu1 %v3514_v63 }
 0x18c   : > { %2941 = vmatprep.subr.bf16.mxu1 %v3534_v27  ;;  %2848 = vmatprep.mubr.f32.mxu0 %v3498_v51 }
 0x18e   : > { %2723 = vmatmul.mubr.f32.gmra.mrb[4].mxu1 %v3522_v13  ;;  %2849 = vmatmul.mubr.f32.gmra.mrb[32].mxu0 %v3543_v54 }
 0x18f   : > { %2943 = vmatpush3.bf16.msra.mxu1 %v3534_v27  ;;  %2725 = vmatprep.mubr.f32.mxu1 %v3567_v28 }
 0x190   : > { %2945 = vmatprep.subr.bf16.mxu1 %v3548_v61 }
 0x192   : > { %2726 = vmatmul.mubr.f32.gmra.mrb[6].mxu1 %v3571_v29 }
 0x193   : > { %2947 = vmatpush3.bf16.msra.mxu1 %v3548_v61  ;;  %2728 = vmatprep.mubr.f32.mxu1 %v3599_v25 }
 0x194   : > { %2949 = vmatprep.subr.bf16.mxu1 %v3519_v10 }
 0x196   : > { %2729 = vmatmul.mubr.f32.gmra.mrb[8].mxu1 %v3607_v3 }
 0x197   : > { %2731 = vmatprep.mubr.f32.mxu1 %v3618_v16 }
 0x19a   : > { %2732 = vmatmul.mubr.f32.gmra.mrb[10].mxu1 %v3634_v35 }
 0x19b   : > { %2734 = vmatprep.mubr.f32.mxu1 %v3644_v52 }
 0x19e   : > { %2735 = vmatmul.mubr.f32.gmra.mrb[12].mxu1 %v3658_v57 }
 0x19f   : > { %2737 = vmatprep.mubr.f32.mxu1 %v3666_v59 }
 0x1a2   : > { %2738 = vmatmul.mubr.f32.gmra.mrb[14].mxu1 %v3681_v24 }
 0x1a3   : > { %2756 = vmatprep.mubr.f32.mxu1 %v1107_v8  ;;  %v3925_v8 = vand.u32 4294901760, %v3618_v16 }
 0x1a6   : > { %2757 = vmatmul.mubr.f32.vlgmr.msra.gmra.mrb[0].mxu1 %v1117_v19 }
 0x1a7   : > { %2951 = vmatpush3.bf16.msra.mxu1 %v3519_v10  ;;  %2759 = vmatprep.mubr.f32.mxu1 %v1127_v0 }
 0x1a8   : > { %2953 = vmatprep.subr.bf16.mxu1 %v3536_v38 }
 0x1aa   : > { %2760 = vmatmul.mubr.f32.gmra.mrb[2].mxu1 %v1137_v23 }
 0x1ab   : > { %2955 = vmatpush3.bf16.msra.mxu1 %v3536_v38  ;;  %2762 = vmatprep.mubr.f32.mxu1 %v1147_v4 }
 0x1ac   : > { %2957 = vmatprep.subr.bf16.mxu1 %v3553_v12 }
 0x1ae   : > { %2763 = vmatmul.mubr.f32.gmra.mrb[4].mxu1 %v1157_v21 }
 0x1af   : > { %2959 = vmatpush3.bf16.msra.mxu1 %v3553_v12  ;;  %2765 = vmatprep.mubr.f32.mxu1 %v1167_v43 }
 0x1b0   : > { %2961 = vmatprep.subr.bf16.mxu1 %v3575_v34 }
 0x1b2   : > { %2766 = vmatmul.mubr.f32.gmra.mrb[6].mxu1 %v1177_v58 }
 0x1b3   : > { %2963 = vmatpush3.bf16.msra.mxu1 %v3575_v34  ;;  %2768 = vmatprep.mubr.f32.mxu1 %v1187_v14 }
 0x1b4   : > { %2980 = vmatprep.subr.bf16.mxu1 %v3492_v47 }
 0x1b6   : > { %2769 = vmatmul.mubr.f32.gmra.mrb[8].mxu1 %v3924_v7 }
 0x1b7   : > { %2771 = vmatprep.mubr.f32.mxu1 %v3925_v8 }
 0x1ba   : > { %2772 = vmatmul.mubr.f32.gmra.mrb[10].mxu1 %v3926_v18 }
 0x1bb   : > { %2774 = vmatprep.mubr.f32.mxu1 %v1227_v55 }
 0x1be   : > { %2775 = vmatmul.mubr.f32.gmra.mrb[12].mxu1 %v1237_v33 }
 0x1bf   : > { %2777 = vmatprep.mubr.f32.mxu1 %v1247_v26 }
 0x1c2   : > { %2778 = vmatmul.mubr.f32.gmra.mrb[14].mxu1 %v1257_v39 }
 0x1c3   : > { %2796 = vmatprep.mubr.f32.mxu1 %v3418_v6 }
 0x1c6   : > { %2797 = vmatmul.mubr.f32.vlgmr.msra.gmra.mrb[0].mxu1 %v3432_v17 }
 0x1c7   : > { %2984 = vmatpush3.bf16.msra.mxu1 %v3492_v47  ;;  %2799 = vmatprep.mubr.f32.mxu1 %v3478_v40 }
 0x1c8   : > { %2981 = vmatprep.subr.bf16.mxu1 %v3517_v1 }
 0x1ca   : > { %2800 = vmatmul.mubr.f32.gmra.mrb[2].mxu1 %v3480_v41 }
 0x1cb   : > { %2985 = vmatpush3.bf16.msra.mxu1 %v3517_v1  ;;  %2802 = vmatprep.mubr.f32.mxu1 %v3485_v44 }
 0x1cc   : > { %2982 = vmatprep.subr.bf16.mxu1 %v3534_v27 }
 0x1ce   : > { %2803 = vmatmul.mubr.f32.gmra.mrb[4].mxu1 %v3487_v45 }
 0x1cf   : > { %2986 = vmatpush3.bf16.msra.mxu1 %v3534_v27  ;;  %2805 = vmatprep.mubr.f32.mxu1 %v3490_v46 }
 0x1d0   : > { %2983 = vmatprep.subr.bf16.mxu1 %v3548_v61 }
 0x1d2   : > { %2806 = vmatmul.mubr.f32.gmra.mrb[6].mxu1 %v3495_v50 }
 0x1d3   : > { %2987 = vmatpush3.bf16.msra.mxu1 %v3548_v61  ;;  %2808 = vmatprep.mubr.f32.mxu1 %v3498_v51 }
 0x1d6   : > { %2809 = vmatmul.mubr.f32.gmra.mrb[8].mxu1 %v3543_v54 }
 0x1d7   : > { %2811 = vmatprep.mubr.f32.mxu1 %v3595_v62 }
 0x1da   : > { %2812 = vmatmul.mubr.f32.gmra.mrb[10].mxu1 %v3602_v2 }
 0x1db   : > { %2814 = vmatprep.mubr.f32.mxu1 %v3627_v31 }
 0x1de   : > { %2815 = vmatmul.mubr.f32.gmra.mrb[12].mxu1 %v3637_v36 }
 0x1df   : > { %2817 = vmatprep.mubr.f32.mxu1 %v3652_v11 }
 0x1e2   : > { %2818 = vmatmul.mubr.f32.gmra.mrb[14].mxu1 %v3669_v32 }
 0x1e3   : > { %2851 = vmatprep.mubr.f32.mxu1 %v3595_v62 }
 0x1e6   : > { %2852 = vmatmul.mubr.f32.vlgmr.msra.gmra.mrb[10].mxu1 %v3602_v2 }
 0x1e7   : > { %2854 = vmatprep.mubr.f32.mxu1 %v3627_v31 }
 0x1ea   : > { %2855 = vmatmul.mubr.f32.gmra.mrb[12].mxu1 %v3637_v36 }
 0x1eb   : > { %2857 = vmatprep.mubr.f32.mxu1 %v3652_v11 }
 0x1ee   : > { %2858 = vmatmul.mubr.f32.gmra.mrb[14].mxu1 %v3669_v32 }
 0x231   : > { %v2638_v6 = vpop.f32.mrb[8].mxu0 }
 0x232   : > { %v1111_v17 = vpop.f32.mrb[9].mxu0 }
 0x235   : > { %v2641_v19 = vpop.f32.mrb[10].mxu0 }
 0x236   : > { %v1131_v40 = vpop.f32.mrb[11].mxu0 }
 0x239   : > { %v2644_v41 = vpop.f32.mrb[12].mxu0 }
 0x23a   : > { %v1151_v44 = vpop.f32.mrb[13].mxu0 }
 0x23d   : > { %v2647_v45 = vpop.f32.mrb[14].mxu0 }
 0x23e   : > { %v1171_v46 = vpop.f32.mrb[15].mxu0 }
 0x241   : > { %v2650_v47 = vpop.f32.mrb[16].mxu0 }
 0x242   : > { %v1191_v50 = vpop.f32.mrb[17].mxu0 }
 0x245   : > { %v2653_v51 = vpop.f32.mrb[18].mxu0 }
 0x246   : > { %v1211_v56 = vpop.f32.mrb[19].mxu0 }
 0x249   : > { %v3814_v60 = vpop.f32.mrb[20].mxu0 }
 0x24a   : > { %v3816_v63 = vpop.f32.mrb[21].mxu0 }
 0x24d   : > { %v3818_v0 = vpop.f32.mrb[22].mxu0 }
 0x24e   : > { %v3820_v1 = vpop.f32.mrb[23].mxu0 }
 0x251   : > { %v2838_v10 = vpop.f32.mrb[24].mxu0 }
 0x252   : > { %v2120_v13 = vpop.f32.mrb[25].mxu0 }
 0x255   : > { %v2841_v23 = vpop.f32.mrb[26].mxu0 }
 0x256   : > { %v2132_v27 = vpop.f32.mrb[27].mxu0 }
 0x259   : > { %v2844_v38 = vpop.f32.mrb[28].mxu0 }
 0x25a   : > { %v2144_v54 = vpop.f32.mrb[29].mxu0 }
 0x25d   : > { %v2847_v61 = vpop.f32.mrb[30].mxu0 }
 0x25e   : > { %v2156_v12 = vpop.f32.mrb[31].mxu0 }
 0x261   : > { %v2850_v4 = vpop.f32.mrb[32].mxu0 }
 0x262   : > { %v2168_v15 = vpop.f32.mrb[33].mxu0 }
 0x299   : > { %v2798_v21 = vpop.f32.mrb[0].mxu1 }
 0x29a   : > { %v2988_v28 = vadd.f32 %v2798_v21, %v2638_v6  ;;  %v1951_v29 = vpop.f32.mrb[1].mxu1 }
 0x29b   : > { %v2990_v34 = vadd.f32 %v1951_v29, %v1111_v17 }
 0x29c   : > { %v2989_v43 = vadd.f32 %v2988_v28, %v2838_v10 }
 0x29d   : > { %v2991_v58 = vadd.f32 %v2990_v34, %v2120_v13  ;;  %v2801_v62 = vpop.f32.mrb[2].mxu1 }
 0x29e   : > { %2216 = vst.msk [vmem:[%s3825_s4 + $0x8] sm:$0xff] %vm2214_vm2, %v2989_v43  ;;  %v2992_v25 = vadd.f32 %v2801_v62, %v2641_v19  ;;  %v1963_v2 = vpop.f32.mrb[3].mxu1 }
 0x29f   : > { %2215 = vst.msk [vmem:[%s3825_s4] sm:$0xff] %vm2214_vm2, %v2991_v58  ;;  %v2994_v3 = vadd.f32 %v1963_v2, %v1131_v40 }
 0x2a0   : > { %v2993_v14 = vadd.f32 %v2992_v25, %v2841_v23 }
 0x2a1   : > { %v2995_v16 = vadd.f32 %v2994_v3, %v2132_v27  ;;  %v2804_v31 = vpop.f32.mrb[4].mxu1 }
 0x2a2   : > { %2218 = vst.msk [vmem:[%s3825_s4 + $0x18] sm:$0xff] %vm2214_vm2, %v2993_v14  ;;  %v2996_v35 = vadd.f32 %v2804_v31, %v2644_v41  ;;  %v1975_v33 = vpop.f32.mrb[5].mxu1 }
 0x2a3   : > { %2217 = vst.msk [vmem:[%s3825_s4 + $0x10] sm:$0xff] %vm2214_vm2, %v2995_v16  ;;  %v2998_v36 = vadd.f32 %v1975_v33, %v1151_v44 }
 0x2a4   : > { %v2997_v52 = vadd.f32 %v2996_v35, %v2844_v38 }
 0x2a5   : > { %v2999_v39 = vadd.f32 %v2998_v36, %v2144_v54  ;;  %v2807_v11 = vpop.f32.mrb[6].mxu1 }
 0x2a6   : > { %2220 = vst.msk [vmem:[%s3825_s4 + $0x28] sm:$0xff] %vm2214_vm2, %v2997_v52  ;;  %v3000_v57 = vadd.f32 %v2807_v11, %v2647_v45  ;;  %v1987_v55 = vpop.f32.mrb[7].mxu1 }
 0x2a7   : > { %2219 = vst.msk [vmem:[%s3825_s4 + $0x20] sm:$0xff] %vm2214_vm2, %v2999_v39  ;;  %v3002_v59 = vadd.f32 %v1987_v55, %v1171_v46 }
 0x2a8   : > { %v3001_v32 = vadd.f32 %v3000_v57, %v2847_v61 }
 0x2a9   : > { %v3003_v26 = vadd.f32 %v3002_v59, %v2156_v12  ;;  %v2810_v24 = vpop.f32.mrb[8].mxu1 }
 0x2aa   : > { %2222 = vst.msk [vmem:[%s3825_s4 + $0x38] sm:$0xff] %vm2214_vm2, %v3001_v32  ;;  %v3004_v48 = vadd.f32 %v2810_v24, %v2650_v47  ;;  %v1999_v53 = vpop.f32.mrb[9].mxu1 }
 0x2ab   : > { %2221 = vst.msk [vmem:[%s3825_s4 + $0x30] sm:$0xff] %vm2214_vm2, %v3003_v26  ;;  %v3006_v20 = vadd.f32 %v1999_v53, %v1191_v50 }
 0x2ac   : > { %v3005_v42 = vadd.f32 %v3004_v48, %v2850_v4 }
 0x2ad   : > { %v3007_v37 = vadd.f32 %v3006_v20, %v2168_v15 }
 0x2ae   : > { %2224 = vst.msk [vmem:[%s3825_s4 + $0x48] sm:$0xff] %vm2214_vm2, %v3005_v42 }
 0x2af   : > { %2223 = vst.msk [vmem:[%s3825_s4 + $0x40] sm:$0xff] %vm2214_vm2, %v3007_v37 }
 0x2b9   : > { %v2853_v5 = vpop.f32.mrb[10].mxu1 }
 0x2ba   : > { %v3008_v30 = vadd.f32 %v2853_v5, %v2653_v51  ;;  %v2180_v22 = vpop.f32.mrb[11].mxu1 }
 0x2bb   : > { %v3009_v49 = vadd.f32 %v2180_v22, %v1211_v56 }
 0x2bc   : > { %2226 = vst.msk [vmem:[%s3825_s4 + $0x58] sm:$0xff] %vm2214_vm2, %v3008_v30 }
 0x2bd   : > { %2225 = vst.msk [vmem:[%s3825_s4 + $0x50] sm:$0xff] %vm2214_vm2, %v3009_v49  ;;  %v2856_v9 = vpop.f32.mrb[12].mxu1 }
 0x2be   : > { %v3010_v7 = vadd.f32 %v2856_v9, %v3814_v60  ;;  %v2192_v8 = vpop.f32.mrb[13].mxu1 }
 0x2bf   : > { %v3011_v18 = vadd.f32 %v2192_v8, %v3816_v63 }
 0x2c0   : > { %2228 = vst.msk [vmem:[%s3825_s4 + $0x68] sm:$0xff] %vm2214_vm2, %v3010_v7 }
 0x2c1   : > { %2227 = vst.msk [vmem:[%s3825_s4 + $0x60] sm:$0xff] %vm2214_vm2, %v3011_v18  ;;  %v2859_v6 = vpop.f32.mrb[14].mxu1 }
 0x2c2   : > { %v3012_v17 = vadd.f32 %v2859_v6, %v3818_v0  ;;  %v2204_v19 = vpop.f32.mrb[15].mxu1 }
 0x2c3   : > { %v3013_v40 = vadd.f32 %v2204_v19, %v3820_v1 }
 0x2c4   : > { %2230 = vst.msk [vmem:[%s3825_s4 + $0x78] sm:$0xff] %vm2214_vm2, %v3012_v17 }
 0x2c5   : > { %2229 = vst.msk [vmem:[%s3825_s4 + $0x70] sm:$0xff] %vm2214_vm2, %v3013_v40 }
 0x2c6   : > { %3162 = shalt.err (!%p3159_p3)
}
 0x2c7   : > { %s3163_s20 = scalar_lea.hbm %s3863_s9, 2048  ;;  %s3167_s26 = scalar_lea.hbm %s3918_s3, 4096 }
 0x2c8   : > { %p3164_p4 = scmp.ne.s32.totalorder %s3863_s9, %s3163_s20  ;;  %p3168_p9 = scmp.lt.u32.totalorder %s3863_s9, %s3918_s3 }
 0x2c9   : > { %p3169_p10 = scmp.lt.u32.totalorder %s3167_s26, %s3163_s20  ;;  %p3171_p12 = scmp.lt.u32.totalorder %s3163_s20, %s3863_s9 }
 0x2ca   : > { %p3165_p7 = pnand %p3164_p4, %p3274_p5 }
 0x2cb   : > { %p3170_p11 = por %p3169_p10, %p3168_p9 }
 0x2cc   : > { %p3166_p8 = pneg %p3165_p7 }
 0x2cd   : > { %p3172_p13 = por %p3171_p12, %p3170_p11 }
 0x2cf   : > { %p3173_p0 = pnand %p3172_p13, %p3166_p8 }
 0x2d1   : > { %3176 = shalt.err (!%p3173_p0)
}
 0x2d2   : > { %s3214_s29 = smov 128   ;;  %s3215_s30 = smov 8  }
 0x2d3   : > { %3108 = dma.vmem_to_hbm [thread:$0]  (%p3274_p5), %s3865_s6, 2048, %s3863_s9, %s3874_s16, %s3214_s29, %s3214_s29, %s3215_s30  }
 0x2d4 PF: > { %p3114_p1 = scmp.ge.s32.totalorder %s3211_s15, 2  ;;  %s2260_s4 = sand.u32 1, %s3199_s12  }
 0x2d5   : > { %s2261_s5 = scalar_lea.sflag [#allocation3], %s2260_s4 }
 0x2d6   : > { %p3111_p2 = pnand %p3114_p1, %p3278_p6 }
 0x2d8   : > { %3194 = dma.done.wait (!%p3111_p2), %s2261_s5, 2048  }
 0x2d9   : > { %3196 = vsyncadd (!%p3111_p2), %s2261_s5, 4294965248  ;;  %p13_p3 = scmp.ge.s32.totalorder %s3261_s18, 4   ;;  %s3927_s12 = smov %s3203_s13 }
 0x2da   : > { %s3928_s13 = smov %s3207_s14  ;;  %s3929_s14 = smov %s3272_s21 }
 0x2db   : > { %s3930_s15 = smov %s3261_s18  ;;  %15 = sbr.rel (!%p13_p3) target bundleno = 3 (0x3), region = 67 }
 0x2e2   :  { %2266 = vsyncpa [#allocation3], 1 }
 0x2e3   :  { %2268 = vsyncpa [#allocation3 + $0x1], 1 }

</bundles_post_ra>
